<compile_context>
chip_gen: v6e
topology: v6e:2x2x1
jax: 0.10.0
libtpu: 0.0.40
codegen_flags: <defaults>
</compile_context>

<pallas_src>
import functools
import math

import jax
import jax.numpy as jnp
from jax.experimental import pallas as pl
from jax.experimental.pallas import tpu as pltpu


def _num_embed_kernel(x_ref, top_ref, sel_ref, wbot_ref, bbot_ref, out_ref, *, nd):
    """x_ref: (TB, n_num); top/wbot/bbot: (1, nd); sel: (n_num, nd); out: (TB, 2*nd)."""
    tb = out_ref.shape[0]

    # "ones" half: x_num == 1, so the result is just (weights + shifted bias),
    # precombined host-side -> one dense full-lane broadcast store, no multiply.
    out_ref[:, :nd] = jnp.broadcast_to(top_ref[...], (tb, nd)).astype(out_ref.dtype)

    # "x" half, fully lane-dense (no per-feature masked stores): lane-expand x with
    # a one-hot block-diagonal matrix (sel[j, j*dim:(j+1)*dim] == 1) on the idle
    # MXU, then a single dense multiply-add on the VPU. precision=HIGHEST makes the
    # expansion exact (selector entries are 0/1; the f32->bf16x3 split sums back
    # exactly), so numerics match the f32 reference.
    x_rep = jnp.dot(x_ref[...], sel_ref[...],
                    preferred_element_type=jnp.float32,
                    precision=jax.lax.Precision.HIGHEST)            # (TB, nd)
    out_ref[:, nd:] = (x_rep * wbot_ref[...] + bbot_ref[...]).astype(out_ref.dtype)


def prepare_num_embedding_params(weights, bias, n_num):
    """One-time, shape-static parameter prep (hoisted out of the per-call path)."""
    F = 2 * n_num
    D = weights.shape[1]
    nd = n_num * D
    w = weights[:F]
    # NOTE: faithfully mirrors the PyTorch forward: the bias is prepended with a
    # zero row and truncated to F rows, i.e. bias row k lands on feature k+1 and
    # the last bias row is dropped. Intentional -- do not "fix".
    brow = jnp.concatenate([jnp.zeros((1, D), dtype=bias.dtype), bias], axis=0)[:F]
    top_flat = (w[:n_num] + brow[:n_num]).reshape(1, nd)      # ones half, precombined
    wbot_flat = w[n_num:].reshape(1, nd)                      # x half, weights (flat)
    bbot_flat = brow[n_num:].reshape(1, nd)                   # x half, bias (flat)
    # One-hot block-diagonal lane-expand matrix for the MXU: sel[j, j*D + d] = 1.
    # TODO(synk): for very large n_num (input_table=True => n_num = d_numerical*d_k)
    # this is quadratic in n_num; store only the diagonal (TF, TF*D) blocks and add
    # a second "parallel" grid axis over feature blocks with feature-tiled params.
    eye = jnp.eye(n_num, dtype=weights.dtype)
    sel = jnp.broadcast_to(eye[:, :, None], (n_num, n_num, D)).reshape(n_num, nd)
    return top_flat, sel, wbot_flat, bbot_flat


def _vmem_budget_bytes():
    """Per-generation safe scoped-VMEM ceiling."""
    try:
        cap = int(pltpu.get_tpu_info().vmem_capacity_bytes)
    except Exception:
        cap = 64 << 20                      # conservative (v7x-sized) fallback
    if cap <= (64 << 20):
        return 48 << 20                     # v7x: leave headroom for compiler scratch
    return int(min(cap - (28 << 20), 100 << 20))   # v5e/v6e: 128 MiB parts


def _pick_block_rows(B, n_num, dim, vmem_budget, target_out_tile_bytes=12 << 20):
    """Batch tile: multiple of 8, ~8-16 MiB output tiles, fits the VMEM budget,
    and keeps >= 2 grid steps (megacore sharding on v7x) when the batch allows."""
    nd = n_num * dim
    out_row = 2 * nd * 4
    in_row = n_num * 4
    params = 2 * (3 * nd + n_num * nd) * 4        # resident params (x2 margin)
    headroom = 4 << 20
    per_row = 2 * (out_row + in_row)              # double-buffered out + in tiles
    budget = max(vmem_budget - params - headroom, per_row * 8)
    tb = min(max(8, (budget // per_row) // 8 * 8),
             max(8, (target_out_tile_bytes // out_row) // 8 * 8))
    if B > 8:                                     # keep at least 2 grid steps
        tb = min(tb, ((pl.cdiv(B, 2) + 7) // 8) * 8)
    tb = min(tb, ((B + 7) // 8) * 8)              # never bigger than padded B
    return max(tb, 8)


def numerical_embedding(x, top_flat, sel, wbot_flat, bbot_flat, *,
                        block_rows=None, out_dtype=None):
    """x: (B, n_num); params from prepare_num_embedding_params. Returns (B, 2*n_num, dim).

    out_dtype=jnp.bfloat16 would halve HBM writeback (the kernel is writeback-bound)
    but is a precision change vs the PyTorch module, so it is opt-in only.
    """
    B, n_num = x.shape
    nd = top_flat.shape[1]
    dim = nd // n_num
    F = 2 * n_num
    out_dtype = x.dtype if out_dtype is None else out_dtype

    budget = _vmem_budget_bytes()
    TB = block_rows if block_rows is not None else _pick_block_rows(B, n_num, dim, budget)
    grid = pl.cdiv(B, TB)   # ragged last block is clipped on writeback; no padding,
                            # no divisibility requirement, no tiny/full-array fallback.

    out_bytes = jnp.dtype(out_dtype).itemsize
    est = (2 * TB * (F * dim * out_bytes + n_num * x.dtype.itemsize)  # dbl-buffered out + x
           + 2 * (3 * nd + n_num * nd) * 4                            # resident params
           + (4 << 20))                                               # headroom
    vmem_limit = int(min(budget, max(est, 16 << 20)))

    out_flat = pl.pallas_call(
        functools.partial(_num_embed_kernel, nd=nd),
        out_shape=jax.ShapeDtypeStruct((B, F * dim), out_dtype),
        grid=(grid,),
        in_specs=[
            pl.BlockSpec((TB, n_num), lambda i: (i, 0)),   # batch-tiled x
            pl.BlockSpec((1, nd), lambda i: (0, 0)),       # VMEM-resident params
            pl.BlockSpec((n_num, nd), lambda i: (0, 0)),
            pl.BlockSpec((1, nd), lambda i: (0, 0)),
            pl.BlockSpec((1, nd), lambda i: (0, 0)),
        ],
        out_specs=pl.BlockSpec((TB, F * dim), lambda i: (i, 0)),   # lane-dense flat out
        compiler_params=pltpu.CompilerParams(
            dimension_semantics=("parallel",),   # megacore sharding on v7x
            vmem_limit_bytes=vmem_limit,
        ),
    )(x, top_flat, sel, wbot_flat, bbot_flat)

    # Metadata-only reshape back to the PyTorch (B, F, dim) layout.
    return out_flat.reshape(B, F, dim)


def _kaiming_uniform(key, shape, a=math.sqrt(5.0)):
    # PyTorch kaiming_uniform_ on a 2D (fan_out, fan_in) tensor: fan_in = shape[1]
    fan_in = shape[1]
    gain = math.sqrt(2.0 / (1.0 + a * a))
    bound = gain * math.sqrt(3.0 / fan_in)
    return jax.random.uniform(key, shape, jnp.float32, minval=-bound, maxval=bound)


def _reference(x, weights, bias):
    # Pure-JAX mirror of the PyTorch Numerical_Embedding.forward.
    x_num = jnp.concatenate([jnp.ones_like(x), x], axis=1)
    out = weights[: x_num.shape[1]] * x_num[:, :, None]
    bias_cat = jnp.concatenate([jnp.zeros((1, bias.shape[1]), bias.dtype), bias], axis=0)
    return out + bias_cat[: out.shape[1]]


if __name__ == "__main__":
    # Small shapes consistent with the module: x (B, n_num), dim_numerical = 2*n_num.
    B, n_num, dim = 16, 8, 32
    dim_numerical = 2 * n_num          # forward slices weights[:2*n_num]

    key = jax.random.PRNGKey(0)
    kx, kw, kb, kx2 = jax.random.split(key, 4)

    x = jax.random.normal(kx, (B, n_num), dtype=jnp.float32)
    weights = _kaiming_uniform(kw, (dim_numerical, dim))
    bias = _kaiming_uniform(kb, (dim_numerical, dim))

    params = prepare_num_embedding_params(weights, bias, n_num)

    # block_rows=8 with B=16 exercises a real 2-step pipelined grid.
    out = jax.block_until_ready(numerical_embedding(x, *params, block_rows=8))
    ref = _reference(x, weights, bias)
    assert out.shape == (B, dim_numerical, dim), out.shape
    assert jnp.allclose(out, ref, atol=1e-5, rtol=1e-5), float(jnp.max(jnp.abs(out - ref)))

    # Ragged batch (B not a multiple of the tile): cdiv grid + clipped last block,
    # auto tile picker (no divisibility assert, no full-array fallback).
    B2 = 13
    x2 = jax.random.normal(kx2, (B2, n_num), dtype=jnp.float32)
    out2 = jax.block_until_ready(numerical_embedding(x2, *params))
    ref2 = _reference(x2, weights, bias)
    assert out2.shape == (B2, dim_numerical, dim), out2.shape
    assert jnp.allclose(out2, ref2, atol=1e-5, rtol=1e-5), float(jnp.max(jnp.abs(out2 - ref2)))

    # TODO(synk): self.linear_layer (float64 Linear) and self.activation are defined
    # in Numerical_Embedding.__init__ but never used in forward(), so they are
    # intentionally omitted; the transformer/VAE stack of Num2Vec is out of scope.
    print("KERNEL_OK")
</pallas_src>

<mosaic_0001>
module attributes {stable_mosaic.version = 11 : i64} {
  func.func @_num_embed_kernel(%arg0: i32, %arg1: memref<8x8xf32, #tpu.memory_space<vmem>>, %arg2: memref<1x256xf32, #tpu.memory_space<vmem>>, %arg3: memref<8x256xf32, #tpu.memory_space<vmem>>, %arg4: memref<1x256xf32, #tpu.memory_space<vmem>>, %arg5: memref<1x256xf32, #tpu.memory_space<vmem>>, %arg6: memref<8x512xf32, #tpu.memory_space<vmem>>) attributes {dimension_semantics = [#tpu.dimension_semantics<parallel>], iteration_bounds = array<i64: 2>, scalar_prefetch = 0 : i64, scratch_operands = 0 : i64, tpu.core_type = #tpu.core_type<tc>, window_params = [{transform_indices = @transform_0, window_bounds = array<i64: 8, 8>}, {pipeline_mode = #tpu.pipeline_mode<synchronous>, transform_indices = @transform_1, window_bounds = array<i64: 1, 256>}, {pipeline_mode = #tpu.pipeline_mode<synchronous>, transform_indices = @transform_2, window_bounds = array<i64: 8, 256>}, {pipeline_mode = #tpu.pipeline_mode<synchronous>, transform_indices = @transform_3, window_bounds = array<i64: 1, 256>}, {pipeline_mode = #tpu.pipeline_mode<synchronous>, transform_indices = @transform_4, window_bounds = array<i64: 1, 256>}, {transform_indices = @transform_5, window_bounds = array<i64: 8, 512>}]} {
    %c0 = arith.constant 0 : index
    %c0_0 = arith.constant 0 : index
    %0 = vector.load %arg2[%c0, %c0_0] : memref<1x256xf32, #tpu.memory_space<vmem>>, vector<1x256xf32>
    %1 = vector.shape_cast %0 : vector<1x256xf32> to vector<1x256xf32>
    %2 = vector.broadcast %1 : vector<1x256xf32> to vector<8x256xf32>
    %c0_1 = arith.constant 0 : index
    %c0_2 = arith.constant 0 : index
    %3 = vector.load %arg6[%c0_1, %c0_2] : memref<8x512xf32, #tpu.memory_space<vmem>>, vector<8x256xf32>
    tpu.vector_store %arg6[%c0_1, %c0_2], %2 {strides = array<i32>} : memref<8x512xf32, #tpu.memory_space<vmem>>, vector<8x256xf32>,
    %c0_3 = arith.constant 0 : index
    %c0_4 = arith.constant 0 : index
    %4 = vector.load %arg1[%c0_3, %c0_4] : memref<8x8xf32, #tpu.memory_space<vmem>>, vector<8x8xf32>
    %c0_5 = arith.constant 0 : index
    %c0_6 = arith.constant 0 : index
    %5 = vector.load %arg3[%c0_5, %c0_6] : memref<8x256xf32, #tpu.memory_space<vmem>>, vector<8x256xf32>
    %cst = arith.constant dense<0.000000e+00> : vector<8x256xf32>
    %6 = tpu.matmul %4, %5, %cst {dimension_numbers = #tpu.dot_dimension_numbers<[1], [0], [0], [1], [0, 0, 1, 1], [], []>, precision = #tpu.contract_precision<fp32>} : vector<8x8xf32>, vector<8x256xf32>, vector<8x256xf32> -> vector<8x256xf32>
    %c0_7 = arith.constant 0 : index
    %c0_8 = arith.constant 0 : index
    %7 = vector.load %arg4[%c0_7, %c0_8] : memref<1x256xf32, #tpu.memory_space<vmem>>, vector<1x256xf32>
    %8 = vector.broadcast %7 : vector<1x256xf32> to vector<8x256xf32>
    %9 = arith.mulf %6, %8 : vector<8x256xf32>
    %c0_9 = arith.constant 0 : index
    %c0_10 = arith.constant 0 : index
    %10 = vector.load %arg5[%c0_9, %c0_10] : memref<1x256xf32, #tpu.memory_space<vmem>>, vector<1x256xf32>
    %11 = vector.broadcast %10 : vector<1x256xf32> to vector<8x256xf32>
    %12 = arith.addf %9, %11 : vector<8x256xf32>
    %c0_11 = arith.constant 0 : index
    %c256 = arith.constant 256 : index
    %13 = vector.load %arg6[%c0_11, %c256] : memref<8x512xf32, #tpu.memory_space<vmem>>, vector<8x256xf32>
    tpu.vector_store %arg6[%c0_11, %c256], %12 {strides = array<i32>} : memref<8x512xf32, #tpu.memory_space<vmem>>, vector<8x256xf32>,
    return
  }
  func.func @transform_0(%arg0: i32) -> (i32, i32) {
    %c0_i32 = arith.constant 0 : i32
    %c0_i32_0 = arith.constant 0 : i32
    return %arg0, %c0_i32 : i32, i32
  }
  func.func @transform_1(%arg0: i32) -> (i32, i32) {
    %c0_i32 = arith.constant 0 : i32
    %c0_i32_0 = arith.constant 0 : i32
    %c0_i32_1 = arith.constant 0 : i32
    return %c0_i32, %c0_i32_0 : i32, i32
  }
  func.func @transform_2(%arg0: i32) -> (i32, i32) {
    %c0_i32 = arith.constant 0 : i32
    %c0_i32_0 = arith.constant 0 : i32
    %c0_i32_1 = arith.constant 0 : i32
    return %c0_i32, %c0_i32_0 : i32, i32
  }
  func.func @transform_3(%arg0: i32) -> (i32, i32) {
    %c0_i32 = arith.constant 0 : i32
    %c0_i32_0 = arith.constant 0 : i32
    %c0_i32_1 = arith.constant 0 : i32
    return %c0_i32, %c0_i32_0 : i32, i32
  }
  func.func @transform_4(%arg0: i32) -> (i32, i32) {
    %c0_i32 = arith.constant 0 : i32
    %c0_i32_0 = arith.constant 0 : i32
    %c0_i32_1 = arith.constant 0 : i32
    return %c0_i32, %c0_i32_0 : i32, i32
  }
  func.func @transform_5(%arg0: i32) -> (i32, i32) {
    %c0_i32 = arith.constant 0 : i32
    %c0_i32_0 = arith.constant 0 : i32
    return %arg0, %c0_i32 : i32, i32
  }
}

</mosaic_0001>

<bundles_post_ra>
// kernel: tpu_custom_call.1
= control target key start
LH: loop header
LB: loop body
LE: loop exit
PB: predicated region body
PF: predicated region fallthrough
CT: control target
= control target key end

     0   :  { %10 = vsyncpa [#allocation3], 0  ;;  %s1069_s0 = inlined_call_operand.vmem [shape: f32[16,8], index: 0, kind: input, shape index: {}]   ;;  %s1070_s1 = inlined_call_operand.vmem [shape: f32[1,256], index: 1, kind: input, shape index: {}]   ;;  %s1071_s2 = inlined_call_operand.vmem [shape: f32[8,256], index: 2, kind: input, shape index: {}]   ;;  %s1072_s3 = inlined_call_operand.vmem [shape: f32[1,256], index: 3, kind: input, shape index: {}]   ;;  %s1073_s4 = inlined_call_operand.vmem [shape: f32[1,256], index: 4, kind: input, shape index: {}]   ;;  %s1074_s5 = inlined_call_operand.hbm [shape: f32[16,512], index: 5, kind: output, shape index: {}]  }
   0x1   :  { %12 = vsyncpa [#allocation3 + $0x1], 0  ;;  %s956_s18 = smov 0   ;;  %s958_s19 = smov 0  }
   0x2   :  { %s960_s20 = smov 0   ;;  %s962_s21 = smov 0  }
   0x3 LB: > { %s977_s22 = sadd.s32 4294967295, %s922_s21   ;;  %s810_s23 = sadd.s32 4294967294, %s922_s21   ;;  %s922_s21 = sphi %s962_s21, %s1080_s21   ;;  %s918_s20 = sphi %s960_s20, %s1079_s20   ;;  %s914_s19 = sphi %s958_s19, %s1078_s19   ;;  %s910_s18 = sphi %s956_s18, %s1077_s18  }
   0x4   : > { %s981_s24 = sadd.s32 1, %s922_s21   ;;  %s135_s25 = sadd.s32 1, %s918_s20 }
   0x5   : > { %s132_s26 = ssub.s32 %s922_s21, %s981_s24  ;;  %p145_p0 = scmp.ne.s32.totalorder %s918_s20, %s914_s19 }
   0x6   : > { %p133_p1 = scmp.eq.s32.totalorder %s132_s26, 0  ;;  %p146_p2 = scmp.eq.s32.totalorder %s977_s22, 1 }
   0x7   : > { %p151_p3 = scmp.ne.s32.totalorder %s914_s19, %s910_s18  ;;  %p152_p4 = scmp.eq.s32.totalorder %s810_s23, 1 }
   0x8   : > { %s992_s27 = scalar_select %p133_p1, %s918_s20, %s135_s25  }
   0x9   : > { %p994_p5 = por %p146_p2, %p145_p0  ;;  %p998_p6 = por %p152_p4, %p151_p3 }
   0xa   : > { %p813_p7 = scmp.ge.s32.totalorder %s922_s21, 1  ;;  %p189_p8 = scmp.lt.s32.totalorder %s922_s21, 3 }
   0xc   : > { %p190_p9 = pnand %p813_p7, %p189_p8 }
   0xd   : > { %p216_p10 = scmp.lt.s32.totalorder (!%p190_p9), %s977_s22, 1  ;;  %s213_s14 = sand.u32 (!%p190_p9), 1, %s914_s19  }
   0xe   : > { %193 = sbr.rel (%p190_p9) target bundleno = 259 (0x103), region = 40  ;;  %s814_s17 = sshll.u32 (!%p190_p9), %s213_s14, 5 }
   0xf   : > { %s1021_s23 = scalar_lea.vmem (!%p190_p9), [#allocation2], %s814_s17  ;;  %s821_s7 = sshll.u32 (!%p190_p9), %s977_s22, 9 }
  0x10   : > { %s751_s8 = sshll.u32 (!%p190_p9), %s1021_s23, 4  ;;  %s749_s11 = scalar_lea.hbm (!%p190_p9), %s1074_s5, %s821_s7  ;;  %s752_s8 = int_to_ptr.vmem [resolvable:$true] %s751_s8 }
  0x11   : > { %s737_s12 = scalar_lea.sflag (!%p190_p9), [#allocation3], %s213_s14  ;;  %s925_s15 = smov (!%p190_p9), [#allocation2]  }
  0x13   : > { %v236_v0 = vld [vmem:[%s1071_s2 + $0x8] sm:$0xff]  ;;  %v235_v1 = vld [vmem:[%s1071_s2] sm:$0xff]  ;;  %v924_v4 = vmov 0.0   ;;  %s217_s9 = scalar_select %p216_p10, %s977_s22, 1  ;;  %vm237_vm0 = vcmask 64512   ;;  %v222_v20 = vlaneseq }
  0x14   : > { %v271_v2 = vand.u32 4294901760, %v236_v0  ;;  %v273_v3 = vand.u32 4294901760, %v235_v1  ;;  %307 = vmatprep.mubr.f32.mxu0 %v924_v4  ;;  %393 = vmatprep.mubr.f32.mxu1 %v924_v4  ;;  %v220_v22 = vld [vmem:[%s1070_s1] sm:$0x3]  ;;  %s866_s22 = sshll.u32 %s925_s15, 4  ;;  %s867_s22 = int_to_ptr.vmem [resolvable:$false] %s866_s22 }
  0x15   : > { %s815_s10 = sshll.u32 %s217_s9, 3  ;;  %v223_v21 = vshrl.u32 %v222_v20, 7  ;;  %v706_v38 = vld [vmem:[%s1072_s3] sm:$0x3]  ;;  %s868_s16 = scalar_lea.vmem %s867_s22, 1024 }
  0x16   : > { %272 = vmatprep.subr.mxu0 %v271_v2  ;;  %v350_v5 = vsub.f32 %v236_v0, %v271_v2  ;;  %v356_v6 = vsub.f32 %v235_v1, %v273_v3  ;;  %s219_s13 = scalar_lea.vmem %s1069_s0, %s815_s10  ;;  %v720_v43 = vld [vmem:[%s1073_s4] sm:$0x3]  ;;  %p869_p0 = scmp.lt.s32.totalorder %s752_s8, %s867_s22 }
  0x17   : > { %274 = vmatpush1.msra.mxu0 %v273_v3  ;;  %v234_v9 = vld [vmem:[%s219_s13] sm:$0xff]  ;;  %v224_v23 = vsub.s32 0, %v223_v21  ;;  %v228_v25 = vsub.s32 1, %v223_v21  ;;  %s862_s13 = scalar_lea.vmem %s752_s8, 512 }
  0x18   : > { %v351_v7 = vand.u32 4294901760, %v350_v5  ;;  %v357_v8 = vand.u32 4294901760, %v356_v6  ;;  %433 = vmatprep.subr.mxu0 %v350_v5  ;;  %v239_v12 = vsel %vm237_vm0, %v234_v9, 0  ;;  %p863_p11 = scmp.ne.s32.totalorder %s752_s8, %s862_s13  ;;  %p870_p1 = scmp.lt.s32.totalorder %s868_s16, %s862_s13 }
  0x19   : > { %v308_v13 = vand.u32 4294901760, %v239_v12  ;;  %v225_v24 = vrot.slane %v220_v22, %v224_v23  ;;  %v229_v26 = vrot.slane %v220_v22, %v228_v25  ;;  %v711_v46 = vrot.slane %v706_v38, %v224_v23 }
  0x1a   : > { %v352_v10 = vsub.f32 %v350_v5, %v351_v7  ;;  %v358_v11 = vsub.f32 %v356_v6, %v357_v8  ;;  %v725_v49 = vrot.slane %v720_v43, %v224_v23  ;;  %v715_v51 = vrot.slane %v706_v38, %v228_v25  ;;  %p864_p12 = pnand %p863_p11, %p994_p5  ;;  %p871_p2 = por %p870_p1, %p869_p0 }
  0x1b   : > { %v309_v16 = vsub.f32 %v239_v12, %v308_v13  ;;  %232 = vst [vmem:[%s1021_s23] sm:$0xff] %v225_v24  ;;  %233 = vst [vmem:[%s1021_s23 + $0x8] sm:$0xff] %v229_v26  ;;  %v729_v55 = vrot.slane %v720_v43, %v228_v25 }
  0x1c   : > { %v353_v14 = vand.u32 4294901760, %v352_v10  ;;  %v359_v15 = vand.u32 4294901760, %v358_v11  ;;  %p865_p13 = pneg %p864_p12 }
  0x1d   : > { %v310_v17 = vand.u32 4294901760, %v309_v16 }
  0x1e   : > { %354 = vmatprep.subr.mxu1 %v353_v14  ;;  %p872_p3 = pnand %p871_p2, %p865_p13 }
  0x1f   : > { %360 = vmatpush1.msra.mxu1 %v359_v15  ;;  %v311_v18 = vsub.f32 %v309_v16, %v310_v17 }
  0x20   : > { %395 = vmatmul.mubr.f32.vlgmr.msra.gmra.mxu1 %v308_v13  ;;  %509 = vmatprep.subr.mxu1 %v271_v2 }
  0x21   : > { %511 = vmatpush1.msra.mxu1 %v273_v3  ;;  %544 = vmatprep.mubr.f32.mxu1 %v924_v4  ;;  %v312_v19 = vand.u32 4294901760, %v311_v18 }
  0x22   : > { %663 = vmatprep.subr.mxu1 %v271_v2 }
  0x23   : > { %313 = vmatmul.mubr.f32.vlgmr.msra.gmra.mxu0 %v312_v19 }
  0x24   : > { %548 = vmatmul.mubr.f32.vlgmr.msra.gmra.mxu1 %v310_v17  ;;  %436 = vmatpush1.msra.mxu0 %v356_v6 }
  0x25   : > { %665 = vmatpush1.msra.mxu1 %v273_v3  ;;  %469 = vmatprep.mubr.f32.mxu0 %v924_v4 }
  0x26   : > { %587 = vmatprep.subr.mxu0 %v351_v7  ;;  %698 = vmatprep.mubr.f32.mxu1 %v924_v4 }
  0x27   : > { %472 = vmatmul.mubr.f32.vlgmr.msra.gmra.mxu0 %v309_v16 }
  0x28   : > { %700 = vmatmul.mubr.f32.vlgmr.msra.gmra.mxu1 %v308_v13  ;;  %591 = vmatpush1.msra.mxu0 %v357_v8 }
  0x29   : > { %624 = vmatprep.mubr.f32.mxu0 %v924_v4 }
  0x2b   : > { %626 = vmatmul.mubr.f32.vlgmr.msra.gmra.mxu0 %v308_v13 }
  0xe0   : > { %v396_v27 = vpop.f32.mrf.mxu1 }
  0xe2   : > { %v398_v28 = vpop.f32.mrf.mxu1 }
  0xe3   : > { %v314_v29 = vpop.f32.mrf.mxu0 }
  0xe4   : > { %v549_v30 = vpop.f32.mrf.mxu1  ;;  %v397_v32 = vadd.f32 %v396_v27, %v314_v29 }
  0xe5   : > { %v316_v31 = vpop.f32.mrf.mxu0 }
  0xe6   : > { %v551_v34 = vpop.f32.mrf.mxu1  ;;  %v399_v35 = vadd.f32 %v398_v28, %v316_v31 }
  0xe7   : > { %v473_v33 = vpop.f32.mrf.mxu0 }
  0xe8   : > { %v474_v36 = vadd.f32 %v473_v33, %v397_v32  ;;  %v701_v42 = vpop.f32.mrf.mxu1 }
  0xe9   : > { %v475_v37 = vpop.f32.mrf.mxu0 }
  0xea   : > { %v550_v39 = vadd.f32 %v549_v30, %v474_v36  ;;  %v476_v40 = vadd.f32 %v475_v37, %v399_v35  ;;  %v703_v52 = vpop.f32.mrf.mxu1 }
  0xeb   : > { %v627_v41 = vpop.f32.mrf.mxu0 }
  0xec   : > { %v552_v44 = vadd.f32 %v551_v34, %v476_v40  ;;  %v628_v45 = vadd.f32 %v627_v41, %v550_v39 }
  0xed   : > { %v629_v47 = vpop.f32.mrf.mxu0 }
  0xee   : > { %v702_v48 = vadd.f32 %v701_v42, %v628_v45  ;;  %v630_v50 = vadd.f32 %v629_v47, %v552_v44 }
  0xf0   : > { %v718_v53 = vmul.f32 %v711_v46, %v702_v48  ;;  %v704_v54 = vadd.f32 %v703_v52, %v630_v50 }
  0xf2   : > { %v732_v56 = vadd.f32 %v725_v49, %v718_v53  ;;  %v719_v57 = vmul.f32 %v715_v51, %v704_v54 }
  0xf4   : > { %734 = vst [vmem:[%s1021_s23 + $0x10] sm:$0xff] %v732_v56  ;;  %v733_v58 = vadd.f32 %v729_v55, %v719_v57 }
  0xf6   : > { %735 = vst [vmem:[%s1021_s23 + $0x18] sm:$0xff] %v733_v58 }
  0xf7   : > { %875 = shalt.err (!%p872_p3)
}
  0xf8   : > { %s876_s17 = scalar_lea.hbm %s749_s11, 512  ;;  %s880_s25 = scalar_lea.hbm %s1074_s5, 1024 }
  0xf9   : > { %p877_p4 = scmp.ne.s32.totalorder %s749_s11, %s876_s17  ;;  %p881_p9 = scmp.lt.s32.totalorder %s749_s11, %s1074_s5 }
  0xfa   : > { %p882_p10 = scmp.lt.s32.totalorder %s880_s25, %s876_s17 }
  0xfb   : > { %p878_p7 = pnand %p877_p4, %p994_p5 }
  0xfc   : > { %p883_p11 = por %p882_p10, %p881_p9 }
  0xfd   : > { %p879_p8 = pneg %p878_p7 }
  0xff   : > { %p884_p12 = pnand %p883_p11, %p879_p8 }
 0x101   : > { %887 = shalt.err (!%p884_p12)
}
 0x102   : > { %822 = dma.vmem_to_hbm [thread:$0]  (%p994_p5), %s752_s8, 512, %s749_s11, %s737_s12  }
 0x103 PF: > { %p828_p13 = scmp.ge.s32.totalorder %s922_s21, 2  ;;  %s763_s6 = sand.u32 1, %s910_s18  }
 0x104   : > { %s764_s7 = scalar_lea.sflag [#allocation3], %s763_s6 }
 0x105   : > { %p825_p0 = pnand %p828_p13, %p998_p6 }
 0x107   : > { %p826_p1 = pneg %p825_p0 }
 0x109   : > { %905 = dma.done.wait (%p826_p1), %s764_s7, 512  }
 0x10a   : > { %907 = vsyncadd (%p826_p1), %s764_s7, 4294966784  ;;  %p15_p2 = scmp.ge.s32.totalorder %s981_s24, 4   ;;  %s1077_s18 = smov %s914_s19 }
 0x10b   : > { %s1078_s19 = smov %s918_s20  ;;  %s1079_s20 = smov %s992_s27 }
 0x10c   : > { %s1080_s21 = smov %s981_s24  ;;  %17 = sbr.rel (!%p15_p2) target bundleno = 3 (0x3), region = 75 }
 0x111   :  { %769 = vsyncpa [#allocation3], 1 }
 0x112   :  { %771 = vsyncpa [#allocation3 + $0x1], 1 }

</bundles_post_ra>
